<compile_context>
chip_gen: v7x
topology: tpu7x:2x2x1
jax: 0.10.0
libtpu: 0.0.40
codegen_flags: <defaults>
</compile_context>

<pallas_src>
import math

import jax
import jax.numpy as jnp
from jax.experimental import pallas as pl
from jax.experimental.pallas import tpu as pltpu


# Temporal-table row layout inside the fused weight (offsets are relative to row 3*C):
# [month | day | weekday | hour]
MONTH_SIZE, DAY_SIZE, WEEKDAY_SIZE, HOUR_SIZE = 13, 32, 7, 24
MONTH_OFF = 0
DAY_OFF = MONTH_OFF + MONTH_SIZE           # 13
WEEKDAY_OFF = DAY_OFF + DAY_SIZE           # 45
HOUR_OFF = WEEKDAY_OFF + WEEKDAY_SIZE      # 52
TEMPORAL_ROWS = HOUR_OFF + HOUR_SIZE       # 76 used temporal rows


# ----------------------------- parameter setup -----------------------------

def sinusoid_table(n_pos, d_model):
    """w[:, 0::2]=sin(pos*div), w[:, 1::2]=cos(pos*div)  (FixedEmbedding / PositionalEmbedding)."""
    position = jnp.arange(n_pos, dtype=jnp.float32)[:, None]
    div_term = jnp.exp(jnp.arange(0, d_model, 2, dtype=jnp.float32)
                       * -(math.log(10000.0) / d_model))
    w = jnp.zeros((n_pos, d_model), dtype=jnp.float32)
    w = w.at[:, 0::2].set(jnp.sin(position * div_term))
    w = w.at[:, 1::2].set(jnp.cos(position * div_term))
    return w


def make_params(key, c_in, d_model):
    """Returns (w_conv f32 for the reference, fused bf16 weight [K, d_model], tables dict)."""
    # Conv1d weight (d_model, c_in, 3): kaiming_normal fan_in / leaky_relu (as in TokenEmbedding).
    fan_in = c_in * 3
    gain = math.sqrt(2.0 / (1.0 + 0.01 ** 2))
    std = gain / math.sqrt(fan_in)
    w_conv = jax.random.normal(key, (d_model, c_in, 3), dtype=jnp.float32) * std

    tables = {
        "month": sinusoid_table(MONTH_SIZE, d_model),
        "day": sinusoid_table(DAY_SIZE, d_model),
        "weekday": sinusoid_table(WEEKDAY_SIZE, d_model),
        "hour": sinusoid_table(HOUR_SIZE, d_model),
    }

    c3 = 3 * c_in
    k_rows = ((c3 + TEMPORAL_ROWS + 127) // 128) * 128   # pad K to a full lane width
    w = jnp.zeros((k_rows, d_model), jnp.float32)
    # Conv taps: lanes [0, c3) of the operand are concat([x[t-1], x[t], x[t+1]]).
    w = w.at[0 * c_in:1 * c_in].set(w_conv[:, :, 0].T)
    w = w.at[1 * c_in:2 * c_in].set(w_conv[:, :, 1].T)
    w = w.at[2 * c_in:3 * c_in].set(w_conv[:, :, 2].T)
    # Temporal tables, shifted by c3.
    t0 = c3
    w = w.at[t0 + MONTH_OFF:t0 + MONTH_OFF + MONTH_SIZE].set(tables["month"])
    w = w.at[t0 + DAY_OFF:t0 + DAY_OFF + DAY_SIZE].set(tables["day"])
    w = w.at[t0 + WEEKDAY_OFF:t0 + WEEKDAY_OFF + WEEKDAY_SIZE].set(tables["weekday"])
    w = w.at[t0 + HOUR_OFF:t0 + HOUR_OFF + HOUR_SIZE].set(tables["hour"])
    w_fused = w.astype(jnp.bfloat16)   # one-hot rows are exact; sinusoid bf16 error ~2^-9
    return w_conv, w_fused, tables


# ------------------------------- Pallas kernel ------------------------------

def data_embedding_kernel(xcat_ref, ids_ref, w_ref, pe_ref, o_ref):
    bt, L, c3 = xcat_ref.shape
    K, D = w_ref.shape
    rows = bt * L

    xcat = xcat_ref[...].reshape(rows, c3)          # bf16, pre-built im2col from the wrapper
    ids = ids_ref[...].reshape(rows, 4)             # int32, already offset by c3 + table offsets

    # Multi-hot over the temporal rows of the fused weight (lanes >= c3).  The four id ranges
    # are disjoint and all >= c3, so OR-ing and adding to the conv lanes never collides.
    iota = jax.lax.broadcasted_iota(jnp.int32, (rows, K), 1)
    mh = ((iota == ids[:, 0:1]) | (iota == ids[:, 1:2])
          | (iota == ids[:, 2:3]) | (iota == ids[:, 3:4])).astype(jnp.bfloat16)

    # Lay xcat into the first c3 lanes of the K-wide operand.  The zero pad keeps lane
    # positions (no cross-lane movement) and the multi-hot already lives at its final lanes.
    pad = jnp.zeros((rows, K - c3), jnp.bfloat16)
    operand = jnp.concatenate([xcat, pad], axis=-1) + mh

    # Single fused MXU matmul (conv + temporal lookups), f32 accumulation.
    acc = jnp.dot(operand, w_ref[...], preferred_element_type=jnp.float32)   # [rows, D]

    # Add positional embedding (broadcast over the batch tile); dropout is identity in eval.
    out = acc.reshape(bt, L, D) + pe_ref[...]
    o_ref[...] = out.astype(o_ref.dtype)


def data_embedding(x, x_mark, w_fused, pe_full, *, rows_per_block=4096,
                   out_dtype=jnp.float32):
    B, L, C = x.shape
    K, D = w_fused.shape
    c3 = 3 * C
    assert K >= c3 + TEMPORAL_ROWS and K % 128 == 0

    # --- hoisted im2col for the circular conv (kernel 3, circular padding 1) ---
    x_prev = jnp.roll(x, 1, axis=1)
    x_next = jnp.roll(x, -1, axis=1)
    xcat = jnp.concatenate([x_prev, x, x_next], axis=-1).astype(jnp.bfloat16)   # [B, L, 3C]

    # --- pre-offset temporal ids (PyTorch mapping: col0 month, col1 weekday, col2 day, col3 hour) ---
    col_off = jnp.array([c3 + MONTH_OFF, c3 + WEEKDAY_OFF, c3 + DAY_OFF, c3 + HOUR_OFF],
                        dtype=jnp.int32)
    ids = x_mark.astype(jnp.int32) + col_off                                    # [B, L, 4]

    pe = pe_full[:L].astype(jnp.float32)                                        # [L, D]

    # --- blocking: whole sequences per step, ~rows_per_block rows per step ---
    # Keep >= 2 grid steps so v7x's two TensorCores both get work; pad B for awkward sizes.
    bt = max(1, min(B, rows_per_block // max(L, 1)))
    if B >= 2:
        bt = min(bt, pl.cdiv(B, 2))
    Bp = pl.cdiv(B, bt) * bt
    if Bp != B:
        xcat = jnp.pad(xcat, ((0, Bp - B), (0, 0), (0, 0)))
        ids = jnp.pad(ids, ((0, Bp - B), (0, 0), (0, 0)), constant_values=c3)

    const2d = lambda shape: pl.BlockSpec(shape, lambda b: (0, 0))

    out = pl.pallas_call(
        data_embedding_kernel,
        out_shape=jax.ShapeDtypeStruct((Bp, L, D), out_dtype),
        grid=(Bp // bt,),
        in_specs=[
            pl.BlockSpec((bt, L, c3), lambda b: (b, 0, 0)),   # im2col'd x (bf16)
            pl.BlockSpec((bt, L, 4), lambda b: (b, 0, 0)),    # offset temporal ids (int32)
            const2d((K, D)),                                  # fused conv+table weight (bf16)
            const2d((L, D)),                                  # positional embedding (f32)
        ],
        out_specs=pl.BlockSpec((bt, L, D), lambda b: (b, 0, 0)),
        compiler_params=pltpu.CompilerParams(
            dimension_semantics=("parallel",),                # v7x: 2 TCs split the batch axis
            vmem_limit_bytes=48 * 1024 * 1024),               # headroom for 4K-row blocks on v5e/v7x
    )(xcat, ids, w_fused, pe)

    return out[:B] if Bp != B else out


# ------------------------------ pure-JAX reference ---------------------------

def reference(x, x_mark, w_conv, pe_full, tables):
    """Faithful f32 port of DataEmbedding.forward (eval mode)."""
    L = x.shape[1]
    # circular Conv1d, kernel 3, padding 1, no bias
    xp = jnp.roll(x, 1, axis=1)
    xn = jnp.roll(x, -1, axis=1)
    val = (jnp.einsum("blc,cd->bld", xp, w_conv[:, :, 0].T)
           + jnp.einsum("blc,cd->bld", x, w_conv[:, :, 1].T)
           + jnp.einsum("blc,cd->bld", xn, w_conv[:, :, 2].T))
    # TemporalEmbedding: hour(col3) + day(col2) + weekday(col1) + month(col0)
    temp = (tables["hour"][x_mark[..., 3]]
            + tables["day"][x_mark[..., 2]]
            + tables["weekday"][x_mark[..., 1]]
            + tables["month"][x_mark[..., 0]])
    return val + temp + pe_full[None, :L]


# ----------------------------------- main ------------------------------------

if __name__ == "__main__":
    B, L, C_IN, D_MODEL = 2, 8, 4, 128   # d_model=128 keeps stores / matmul N lane-dense

    key = jax.random.PRNGKey(0)
    k_w, k_x, k_m = jax.random.split(key, 3)

    w_conv, w_fused, tables = make_params(k_w, C_IN, D_MODEL)
    pe_full = sinusoid_table(5000, D_MODEL)

    x = jax.random.normal(k_x, (B, L, C_IN), dtype=jnp.float32)
    # x_mark columns (PyTorch TemporalEmbedding): col0 month(<13), col1 weekday(<7),
    # col2 day(<32), col3 hour(<24).
    maxes = jnp.array([MONTH_SIZE, WEEKDAY_SIZE, DAY_SIZE, HOUR_SIZE], dtype=jnp.int32)
    x_mark = jax.random.randint(k_m, (B, L, 4), 0, 10_000, dtype=jnp.int32) % maxes

    out = data_embedding(x, x_mark, w_fused, pe_full)
    out = jax.block_until_ready(out)

    ref = reference(x, x_mark, w_conv, pe_full, tables)
    assert out.shape == (B, L, D_MODEL)
    err = float(jnp.max(jnp.abs(out - ref)))
    # Tolerance covers the kernel's bf16 operands (im2col'd x, conv weight, sinusoid tables)
    # and TPU's reduced-precision f32 matmul defaults in the XLA reference; structural bugs
    # would show up as O(1) errors.
    assert jnp.allclose(out, ref, atol=4e-2, rtol=4e-2), f"max err {err}"
    print("KERNEL_OK")
</pallas_src>

<mosaic_0001>
module attributes {stable_mosaic.version = 11 : i64} {
  func.func @data_embedding_kernel(%arg0: i32, %arg1: memref<1x8x12xbf16, #tpu.memory_space<vmem>>, %arg2: memref<1x8x4xi32, #tpu.memory_space<vmem>>, %arg3: memref<128x128xbf16, #tpu.memory_space<vmem>>, %arg4: memref<8x128xf32, #tpu.memory_space<vmem>>, %arg5: memref<1x8x128xf32, #tpu.memory_space<vmem>>) attributes {dimension_semantics = [#tpu.dimension_semantics<parallel>], iteration_bounds = array<i64: 2>, scalar_prefetch = 0 : i64, scratch_operands = 0 : i64, tpu.core_type = #tpu.core_type<tc>, window_params = [{transform_indices = @transform_0, window_bounds = array<i64: 1, 8, 12>}, {transform_indices = @transform_1, window_bounds = array<i64: 1, 8, 4>}, {pipeline_mode = #tpu.pipeline_mode<synchronous>, transform_indices = @transform_2, window_bounds = array<i64: 128, 128>}, {pipeline_mode = #tpu.pipeline_mode<synchronous>, transform_indices = @transform_3, window_bounds = array<i64: 8, 128>}, {transform_indices = @transform_4, window_bounds = array<i64: 1, 8, 128>}]} {
    %c0 = arith.constant 0 : index
    %c0_0 = arith.constant 0 : index
    %c0_1 = arith.constant 0 : index
    %0 = vector.load %arg1[%c0, %c0_0, %c0_1] : memref<1x8x12xbf16, #tpu.memory_space<vmem>>, vector<1x8x12xbf16>
    %1 = vector.shape_cast %0 : vector<1x8x12xbf16> to vector<8x12xbf16>
    %c0_2 = arith.constant 0 : index
    %c0_3 = arith.constant 0 : index
    %c0_4 = arith.constant 0 : index
    %2 = vector.load %arg2[%c0_2, %c0_3, %c0_4] : memref<1x8x4xi32, #tpu.memory_space<vmem>>, vector<1x8x4xi32>
    %3 = vector.shape_cast %2 : vector<1x8x4xi32> to vector<8x4xi32>
    %4 = tpu.iota {dimensions = array<i32: 1>} : vector<8x128xi32>
    %5 = vector.extract_strided_slice %3 {offsets = [0, 0], sizes = [8, 1], strides = [1, 1]} : vector<8x4xi32> to vector<8x1xi32>
    %6 = vector.broadcast %5 : vector<8x1xi32> to vector<8x128xi32>
    %7 = arith.cmpi eq, %4, %6 : vector<8x128xi32>
    %8 = vector.extract_strided_slice %3 {offsets = [0, 1], sizes = [8, 1], strides = [1, 1]} : vector<8x4xi32> to vector<8x1xi32>
    %9 = vector.broadcast %8 : vector<8x1xi32> to vector<8x128xi32>
    %10 = arith.cmpi eq, %4, %9 : vector<8x128xi32>
    %11 = arith.ori %7, %10 : vector<8x128xi1>
    %12 = vector.extract_strided_slice %3 {offsets = [0, 2], sizes = [8, 1], strides = [1, 1]} : vector<8x4xi32> to vector<8x1xi32>
    %13 = vector.broadcast %12 : vector<8x1xi32> to vector<8x128xi32>
    %14 = arith.cmpi eq, %4, %13 : vector<8x128xi32>
    %15 = arith.ori %11, %14 : vector<8x128xi1>
    %16 = vector.extract_strided_slice %3 {offsets = [0, 3], sizes = [8, 1], strides = [1, 1]} : vector<8x4xi32> to vector<8x1xi32>
    %17 = vector.broadcast %16 : vector<8x1xi32> to vector<8x128xi32>
    %18 = arith.cmpi eq, %4, %17 : vector<8x128xi32>
    %19 = arith.ori %15, %18 : vector<8x128xi1>
    %20 = arith.extui %19 : vector<8x128xi1> to vector<8x128xi32>
    %21 = arith.sitofp %20 : vector<8x128xi32> to vector<8x128xf32>
    %22 = arith.truncf %21 : vector<8x128xf32> to vector<8x128xbf16>
    %cst = arith.constant 0.000000e+00 : bf16
    %23 = vector.broadcast %cst : bf16 to vector<8x116xbf16>
    %24 = tpu.concatenate %1, %23 in 1 : vector<8x12xbf16>, vector<8x116xbf16> -> vector<8x128xbf16>
    %25 = arith.addf %24, %22 : vector<8x128xbf16>
    %c0_5 = arith.constant 0 : index
    %c0_6 = arith.constant 0 : index
    %26 = vector.load %arg3[%c0_5, %c0_6] : memref<128x128xbf16, #tpu.memory_space<vmem>>, vector<128x128xbf16>
    %cst_7 = arith.constant dense<0.000000e+00> : vector<8x128xf32>
    %27 = tpu.matmul %25, %26, %cst_7 {dimension_numbers = #tpu.dot_dimension_numbers<[1], [0], [0], [1], [0, 0, 1, 1], [], []>} : vector<8x128xbf16>, vector<128x128xbf16>, vector<8x128xf32> -> vector<8x128xf32>
    %28 = vector.shape_cast %27 : vector<8x128xf32> to vector<1x8x128xf32>
    %c0_8 = arith.constant 0 : index
    %c0_9 = arith.constant 0 : index
    %29 = vector.load %arg4[%c0_8, %c0_9] : memref<8x128xf32, #tpu.memory_space<vmem>>, vector<8x128xf32>
    %30 = vector.shape_cast %29 : vector<8x128xf32> to vector<1x8x128xf32>
    %31 = arith.addf %28, %30 : vector<1x8x128xf32>
    %c0_10 = arith.constant 0 : index
    %c0_11 = arith.constant 0 : index
    %c0_12 = arith.constant 0 : index
    %32 = vector.load %arg5[%c0_10, %c0_11, %c0_12] : memref<1x8x128xf32, #tpu.memory_space<vmem>>, vector<1x8x128xf32>
    tpu.vector_store %arg5[%c0_10, %c0_11, %c0_12], %31 {strides = array<i32>} : memref<1x8x128xf32, #tpu.memory_space<vmem>>, vector<1x8x128xf32>,
    return
  }
  func.func @transform_0(%arg0: i32) -> (i32, i32, i32) {
    %c0_i32 = arith.constant 0 : i32
    %c0_i32_0 = arith.constant 0 : i32
    %c0_i32_1 = arith.constant 0 : i32
    return %arg0, %c0_i32, %c0_i32_0 : i32, i32, i32
  }
  func.func @transform_1(%arg0: i32) -> (i32, i32, i32) {
    %c0_i32 = arith.constant 0 : i32
    %c0_i32_0 = arith.constant 0 : i32
    %c0_i32_1 = arith.constant 0 : i32
    return %arg0, %c0_i32, %c0_i32_0 : i32, i32, i32
  }
  func.func @transform_2(%arg0: i32) -> (i32, i32) {
    %c0_i32 = arith.constant 0 : i32
    %c0_i32_0 = arith.constant 0 : i32
    %c0_i32_1 = arith.constant 0 : i32
    return %c0_i32, %c0_i32_0 : i32, i32
  }
  func.func @transform_3(%arg0: i32) -> (i32, i32) {
    %c0_i32 = arith.constant 0 : i32
    %c0_i32_0 = arith.constant 0 : i32
    %c0_i32_1 = arith.constant 0 : i32
    return %c0_i32, %c0_i32_0 : i32, i32
  }
  func.func @transform_4(%arg0: i32) -> (i32, i32, i32) {
    %c0_i32 = arith.constant 0 : i32
    %c0_i32_0 = arith.constant 0 : i32
    %c0_i32_1 = arith.constant 0 : i32
    return %arg0, %c0_i32, %c0_i32_0 : i32, i32, i32
  }
}

</mosaic_0001>

<bundles_post_ra>
// kernel: tpu_custom_call.1
= control target key start
LH: loop header
LB: loop body
LE: loop exit
PB: predicated region body
PF: predicated region fallthrough
CT: control target
= control target key end

     0   :  { %9 = vsyncpa [#allocation3], 0  ;;  %s860_s0 = inlined_call_operand.vmem [shape: bf16[2,8,12], index: 0, kind: input, shape index: {}]   ;;  %s861_s1 = inlined_call_operand.vmem [shape: s32[2,8,4], index: 1, kind: input, shape index: {}]   ;;  %s862_s2 = inlined_call_operand.hbm [shape: bf16[128,128], index: 2, kind: input, shape index: {}]   ;;  %s863_s3 = inlined_call_operand.vmem [shape: f32[8,128], index: 3, kind: input, shape index: {}]   ;;  %s864_s4 = inlined_call_operand.hbm [shape: f32[2,8,128], index: 4, kind: output, shape index: {}]  }
   0x1   :  { %10 = vsyncpa [#allocation4], 0 }
   0x2   :  { %12 = vsyncpa [#allocation4 + $0x1], 0  ;;  %s715_s15 = smov 0   ;;  %s717_s16 = smov 0  }
   0x3   :  { %s719_s17 = smov 0   ;;  %s721_s18 = smov 0  }
   0x4 LB: > { %s736_s19 = sadd.s32 4294967295, %s678_s18   ;;  %s462_s20 = sadd.s32 4294967294, %s678_s18   ;;  %s678_s18 = sphi %s721_s18, %s880_s18   ;;  %s674_s17 = sphi %s719_s17, %s879_s17   ;;  %s670_s16 = sphi %s717_s16, %s878_s16   ;;  %s666_s15 = sphi %s715_s15, %s877_s15  }
   0x5   : > { %s740_s21 = sadd.s32 1, %s678_s18   ;;  %s119_s22 = sadd.s32 1, %s674_s17 }
   0x6   : > { %s116_s23 = ssub.s32 %s678_s18, %s740_s21  ;;  %p129_p0 = scmp.ne.s32.totalorder %s674_s17, %s670_s16 }
   0x7   : > { %p117_p1 = scmp.eq.s32.totalorder %s116_s23, 0  ;;  %p130_p2 = scmp.eq.s32.totalorder %s736_s19, 1 }
   0x8   : > { %p135_p3 = scmp.ne.s32.totalorder %s670_s16, %s666_s15  ;;  %p136_p4 = scmp.eq.s32.totalorder %s462_s20, 1 }
   0x9   : > { %s751_s24 = scalar_select %p117_p1, %s674_s17, %s119_s22  }
   0xa   : > { %p753_p5 = por %p130_p2, %p129_p0  ;;  %p757_p6 = por %p136_p4, %p135_p3 }
   0xb   : > { %p463_p7 = scmp.ge.s32.totalorder %s678_s18, 1  ;;  %p143_p8 = scmp.lt.s32.totalorder %s678_s18, 3 }
   0xc   : > { %s868_s25 = scalar_select %p753_p5, 1, 0 }
   0xd   : > { %s869_s26 = scalar_select %p757_p6, 1, 0 }
   0xe   : > { %p865_p9 = scmp.eq.s32.totalorder %s736_s19, 0  ;;  %p764_p10 = pnand %p463_p7, %p143_p8 }
   0xf   : > { %s680_s28 = smov [#allocation2]   ;;  %s584_s7 = scalar_lea.hbm %s862_s2, 1024 }
  0x10   : > { %s870_s27 = scalar_select %p764_p10, 1, 0 }
  0x11   : > { %s155_s29 = sshll.u32 %s680_s28, 4  ;;  %p519_p11 = pneg %p764_p10  ;;  %s156_s29 = int_to_ptr.vmem [resolvable:$true] %s155_s29 }
  0x12   : > { %p585_p13 = scmp.ne.s32.totalorder %s862_s2, %s584_s7  ;;  %p591_p3 = scmp.lt.u32.totalorder %s584_s7, %s862_s2 }
  0x13   : > { %p772_p12 = pnand %p865_p9, %p519_p11 }
  0x15   : > { %p586_p0 = pneg %p772_p12 }
  0x17   : > { %p587_p1 = pnand %p586_p0, %p585_p13 }
  0x19   : > { %p588_p2 = pneg %p587_p1 }
  0x1b   : > { %p593_p4 = pnand %p591_p3, %p588_p2 }
  0x1d   : > { %596 = shalt.err (!%p593_p4)
}
  0x1e   : > { %s597_s12 = scalar_lea.vmem %s156_s29, 1024  ;;  %p605_p9 = scmp.lt.s32.totalorder %s156_s29, %s156_s29 }
  0x1f   : > { %p598_p7 = scmp.ne.s32.totalorder %s156_s29, %s597_s12  ;;  %p606_p6 = scmp.lt.s32.totalorder %s597_s12, %s597_s12 }
  0x21   : > { %p600_p8 = pnand %p598_p7, %p586_p0  ;;  %p607_p5 = por %p606_p6, %p605_p9 }
  0x23   : > { %p601_p11 = pneg %p600_p8 }
  0x25   : > { %p608_p10 = pnand %p607_p5, %p601_p11 }
  0x27   : > { %611 = shalt.err (!%p608_p10)
}
  0x28   : > { %s681_s13 = smov 64   ;;  %s682_s14 = smov 4  }
  0x29   : > { %522 = dma.hbm_to_vmem [thread:$0]  (!%p772_p12), %s862_s2, 1024, %s156_s29, [#allocation3], %s681_s13, %s681_s13, %s682_s14  }
  0x2a   : > { %p872_p13 = scmp.ne.s32.totalorder %s870_s27, 0 }
  0x2b   : > { %p873_p1 = scmp.eq.s32.totalorder (!%p872_p13), %s736_s19, 0 }
  0x2c   : > { %188 = sbr.rel (%p872_p13) target bundleno = 429 (0x1ad), region = 36 }
  0x33   : > { %657 = dma.done.wait (%p873_p1), [#allocation3], 1024   ;;  %p874_p0 = pmov %p873_p1 }
  0x34   : > { %p217_p5 = scmp.lt.s32.totalorder %s736_s19, 1  ;;  %v683_v0 = vmov 0   ;;  %v684_v1 = vmov 2   ;;  %v685_v2 = vmov 0.0   ;;  %v576_v4 = vld [vmem:[#allocation2] sm:$0xff]   ;;  %v577_v5 = vld [vmem:[#allocation2 + $0x8] sm:$0xff]   ;;  %v228_v14 = vlaneseq }
  0x35   : > { %659 = vsyncadd (%p874_p0), [#allocation3], 4294966272  ;;  %571 = vset.pattern.permute.xlu0 %v683_v0  ;;  %573 = vset.pattern.permute.xlu1 %v684_v1  ;;  %v686_v6 = vmov 1   ;;  %v687_v7 = vmov 3   ;;  %v578_v8 = vld [vmem:[#allocation2 + $0x10] sm:$0xff]   ;;  %v579_v9 = vld [vmem:[#allocation2 + $0x18] sm:$0xff]  }
  0x36   : > { %s800_s23 = scalar_select %p217_p5, %s736_s19, 1  ;;  %493 = vmatprep.subr.bf16.mxu0 %v685_v2  ;;  %vm688_vm0 = vmmov 0   ;;  %v580_v10 = vld [vmem:[#allocation2 + $0x20] sm:$0xff]   ;;  %v581_v11 = vld [vmem:[#allocation2 + $0x28] sm:$0xff]   ;;  %v582_v12 = vld [vmem:[#allocation2 + $0x30] sm:$0xff]   ;;  %v229_v17 = vand.u32 127, %v228_v14 }
  0x37   : > { %494 = vmatpush3.bf16.msra.mxu0 %v576_v4  ;;  %509 = vmatprep.mubr.msk.bf16.mxu0 %vm688_vm0, %v685_v2  ;;  %v583_v13 = vld [vmem:[#allocation2 + $0x38] sm:$0xff]   ;;  %vm252_vm6 = vcmask 97280   ;;  %s214_s9 = sand.u32 1, %s670_s16   ;;  %v362_v25 = vld [vmem:[%s863_s3] sm:$0xff]  ;;  %s481_s13 = sshll.u32 %s736_s19, 7 }
  0x38   : > { %s470_s27 = sshll.u32 %s800_s23, 3  ;;  %495 = vmatprep.subr.bf16.mxu0 %v685_v2  ;;  %s469_s5 = sshll.u32 %s800_s23, 2 }
  0x39   : > { %s224_s30 = scalar_lea.vmem %s861_s1, %s470_s27  ;;  %s220_s8 = scalar_lea.vmem %s860_s0, %s469_s5 }
  0x3a   : > { %v227_v3 = vld [vmem:[%s224_s30] sm:$0xff]  ;;  %s468_s10 = sshll.u32 %s214_s9, 3  ;;  %s818_s27 = scalar_lea.hbm %s864_s4, %s481_s13 }
  0x3b   : > { %231 = vperm.xlu0 %571, %v227_v3   ;;  %240 = vperm.xlu1 %573, %v227_v3   ;;  %v226_v20 = vld [vmem:[%s220_s8] sm:$0xf]  ;;  %s216_s14 = scalar_lea.vmem [#allocation5], %s468_s10  ;;  %s366_s28 = scalar_lea.sflag [#allocation4], %s214_s9 }
  0x3c   : > { %496 = vmatpush3.bf16.msra.mxu0 %v577_v5  ;;  %v255_v22 = vsel %vm252_vm6, %v226_v20, 0  ;;  %s379_s20 = sshll.u32 %s216_s14, 4  ;;  %p875_p9 = scmp.ne.s32.totalorder %s868_s25, 0  ;;  %s820_s20 = int_to_ptr.vmem [resolvable:$true] %s379_s20 }
  0x3d   : > { %497 = vmatprep.subr.bf16.mxu0 %v685_v2  ;;  %s612_s19 = scalar_lea.vmem %s820_s20, 128  ;;  %s689_s29 = smov [#allocation5]  }
  0x3e   : > { %p613_p6 = scmp.ne.s32.totalorder %s820_s20, %s612_s19  ;;  %s616_s30 = sshll.u32 %s689_s29, 4  ;;  %s617_s30 = int_to_ptr.vmem [resolvable:$false] %s616_s30 }
  0x3f   : > { %572 = vset.pattern.permute.xlu0 %v686_v6  ;;  %574 = vset.pattern.permute.xlu1 %v687_v7  ;;  %s618_s5 = scalar_lea.vmem %s617_s30, 256  ;;  %p619_p2 = scmp.lt.s32.totalorder %s820_s20, %s617_s30 }
  0x40   : > { %235 = vperm.xlu0 %572, %v227_v3   ;;  %245 = vperm.xlu1 %574, %v227_v3   ;;  %p614_p10 = pnand %p613_p6, %p875_p9  ;;  %p620_p3 = scmp.lt.s32.totalorder %s618_s5, %s612_s19 }
  0x41   : > { %498 = vmatpush3.bf16.msra.mxu0 %v578_v8 }
  0x42   : > { %499 = vmatprep.subr.bf16.mxu0 %v685_v2  ;;  %p615_p12 = pneg %p614_p10  ;;  %p621_p4 = por %p620_p3, %p619_p2 }
  0x44   : > { %575 = vset.pattern.permute.xlu0 %v687_v7  ;;  %p622_p7 = pnand %p621_p4, %p615_p12 }
  0x45   : > { %500 = vmatpush3.bf16.msra.mxu0 %v579_v9 }
  0x46   : > { %501 = vmatprep.subr.bf16.mxu0 %v685_v2 }
  0x49   : > { %502 = vmatpush3.bf16.msra.mxu0 %v580_v10 }
  0x4a   : > { %503 = vmatprep.subr.bf16.mxu0 %v685_v2 }
  0x4d   : > { %504 = vmatpush3.bf16.msra.mxu0 %v581_v11 }
  0x4e   : > { %505 = vmatprep.subr.bf16.mxu0 %v685_v2 }
  0x51   : > { %506 = vmatpush3.bf16.msra.mxu0 %v582_v12 }
  0x52   : > { %507 = vmatprep.subr.bf16.mxu0 %v685_v2 }
  0x55   : > { %508 = vmatpush3.bf16.msra.mxu0 %v583_v13 }
  0xba   : > { %v232_v15 = vpop.permute.xlu0 %231  ;;  %v241_v16 = vpop.permute.xlu1 %240 }
  0xbb   : > { %vm233_vm1 = vcmp.eq.s32.totalorder %v229_v17, %v232_v15  ;;  %vm242_vm4 = vcmp.eq.s32.totalorder %v229_v17, %v241_v16 }
  0xbf   : > { %v236_v18 = vpop.permute.xlu0 %235  ;;  %v246_v19 = vpop.permute.xlu1 %245 }
  0xc0   : > { %vm237_vm2 = vcmp.eq.s32.totalorder %v229_v17, %v236_v18  ;;  %vm247_vm3 = vcmp.eq.s32.totalorder %v229_v17, %v246_v19 }
  0xc1   : > { %vm238_vm5 = vmor %vm233_vm1, %vm237_vm2 }
  0xc2   : > { %vm243_vm7 = vmor %vm238_vm5, %vm242_vm4 }
  0xc3   : > { %vm248_vm8 = vmor %vm243_vm7, %vm247_vm3 }
  0xc4   : > { %v471_v21 = vsel %vm248_vm8, 1.0, %v685_v2 }
  0xc5   : > { %v251_v23 = vpack.c.bf16 %v471_v21, %v471_v21 }
  0xc7   : > { %v257_v24 = vadd.bf16 %v255_v22, %v251_v23 }
  0xc9   : > { %510 = vmatmul.mubr.bf16.vlgmr.msra.gmra.mrb[0].mxu0 %v257_v24 }
 0x19c   : > { %v356_v26 = vpop.f32.mrb[0].mxu0 }
 0x19d   : > { %v363_v27 = vadd.f32 %v362_v25, %v356_v26  ;;  %v511_v28 = vpop.f32.mrb[1].mxu0 }
 0x19e   : > { %v359_v29 = vpop.f32.mrb[2].mxu0 }
 0x19f   : > { %364 = vst [vmem:[%s216_s14] sm:$0xff] %v363_v27  ;;  %v512_v30 = vpop.f32.mrb[3].mxu0 }
 0x1a0   : > { %625 = shalt.err (!%p622_p7)
}
 0x1a1   : > { %s626_s6 = scalar_lea.hbm %s818_s27, 128  ;;  %s630_s9 = scalar_lea.hbm %s864_s4, 256 }
 0x1a2   : > { %p627_p8 = scmp.ne.s32.totalorder %s818_s27, %s626_s6  ;;  %p631_p1 = scmp.lt.u32.totalorder %s818_s27, %s864_s4 }
 0x1a3   : > { %p632_p0 = scmp.lt.u32.totalorder %s630_s9, %s626_s6  ;;  %p634_p6 = scmp.lt.u32.totalorder %s626_s6, %s818_s27 }
 0x1a4   : > { %p628_p11 = pnand %p627_p8, %p875_p9 }
 0x1a5   : > { %p633_p5 = por %p632_p0, %p631_p1 }
 0x1a6   : > { %p629_p13 = pneg %p628_p11 }
 0x1a7   : > { %p635_p10 = por %p634_p6, %p633_p5 }
 0x1a9   : > { %p636_p12 = pnand %p635_p10, %p629_p13 }
 0x1ab   : > { %639 = shalt.err (!%p636_p12)
}
 0x1ac   : > { %517 = dma.vmem_to_hbm [thread:$0]  (%p875_p9), %s820_s20, 128, %s818_s27, %s366_s28  }
 0x1ad PF: > { %p529_p2 = scmp.ge.s32.totalorder %s678_s18, 2  ;;  %s391_s12 = sand.u32 1, %s666_s15  }
 0x1ae   : > { %p876_p3 = scmp.ne.s32.totalorder %s869_s26, 0  ;;  %s392_s13 = scalar_lea.sflag [#allocation4], %s391_s12 }
 0x1b0   : > { %p524_p4 = pnand %p529_p2, %p876_p3 }
 0x1b2   : > { %661 = dma.done.wait (!%p524_p4), %s392_s13, 128  }
 0x1b3   : > { %663 = vsyncadd (!%p524_p4), %s392_s13, 4294967168  ;;  %p15_p7 = scmp.ge.s32.totalorder %s740_s21, 4   ;;  %s877_s15 = smov %s670_s16 }
 0x1b4   : > { %s878_s16 = smov %s674_s17  ;;  %s879_s17 = smov %s751_s24 }
 0x1b5   : > { %s880_s18 = smov %s740_s21  ;;  %17 = sbr.rel (!%p15_p7) target bundleno = 4 (0x4), region = 79 }
 0x1bc   :  { %397 = vsyncpa [#allocation3], 1 }
 0x1bd   :  { %399 = vsyncpa [#allocation3 + $0x1], 1 }
 0x1be   :  { %400 = vsyncpa [#allocation4], 1 }
 0x1bf   :  { %402 = vsyncpa [#allocation4 + $0x1], 1 }

</bundles_post_ra>
